<compile_context>
chip_gen: v5e
topology: v5e:2x2
jax: 0.10.0
libtpu: 0.0.40
codegen_flags: <defaults>
</compile_context>

<pallas_src>
import functools

import jax
import jax.numpy as jnp
from jax import lax
from jax.experimental import pallas as pl
from jax.experimental.pallas import tpu as pltpu


def ann_kernel(x_ref, w1_ref, b1_ref, w2_ref, b2_ref, out_ref):
    # x_ref:  (TILE_B, IN)  -- natural (batch, feature) layout, contiguous DMA per tile
    # w1_ref: (H, IN)   b1_ref: (H, 1)   -- VMEM-resident (constant index_map)
    # w2_ref: (OUT, H)  b2_ref: (OUT, 1)
    # out_ref: (OUT, TILE_B) -- lane-dense output slab (batch on the 128-lane axis)
    x = x_ref[...]

    # fc1 + sigmoid: contract the feature axis of both operands,
    # (H, IN) x (TILE_B, IN) -> (H, TILE_B); batch lands on the lane axis.
    h = lax.dot_general(
        w1_ref[...],
        x,
        dimension_numbers=(((1,), (1,)), ((), ())),
        preferred_element_type=jnp.float32,
    ) + b1_ref[...]
    h = jax.nn.sigmoid(h)

    # output layer: (OUT, H) @ (H, TILE_B) -> (OUT, TILE_B)
    logits = jnp.dot(w2_ref[...], h, preferred_element_type=jnp.float32) + b2_ref[...]

    # softmax over the class axis (axis 0, only 3 rows -> cheap sublane reduce)
    m = jnp.max(logits, axis=0, keepdims=True)
    e = jnp.exp(logits - m)
    denom = jnp.sum(e, axis=0, keepdims=True)
    out_ref[...] = (e * pl.reciprocal(denom, approx=False)).astype(out_ref.dtype)


@functools.partial(jax.jit, static_argnames=("tile_b",))
def ann_forward(x, w1, b1, w2, b2, tile_b=32768):
    """x: (B, 18); w1: (8, 18); b1: (8,); w2: (3, 8); b2: (3,)  (PyTorch layout)."""
    B, IN = x.shape
    H = w1.shape[0]
    OUT = w2.shape[0]

    # Batch tile: multiple of the 128-lane width; cap at ~ceil(B/2) (rounded up to
    # 128) so the grid has >=2 steps whenever B > 128 (megacore sharding on v7x),
    # and at the user tile (default 32768 -> ~5.5 MB/step with double-buffering,
    # safely under every generation's scoped-VMEM default).
    half_b = pl.cdiv(pl.cdiv(B, 2), 128) * 128
    tile_b = max(128, (min(tile_b, half_b) // 128) * 128)
    grid_b = pl.cdiv(B, tile_b)
    b_pad = grid_b * tile_b

    b1c = b1.reshape(H, 1).astype(jnp.float32)
    b2c = b2.reshape(OUT, 1).astype(jnp.float32)

    cost = pl.CostEstimate(
        flops=2 * b_pad * (IN * H + H * OUT),
        transcendentals=b_pad * (H + OUT),  # sigmoid + exp
        bytes_accessed=4 * (B * IN + b_pad * OUT + H * IN + H + OUT * H + OUT),
    )

    out_t = pl.pallas_call(
        ann_kernel,
        out_shape=jax.ShapeDtypeStruct((OUT, b_pad), jnp.float32),
        grid=(grid_b,),
        in_specs=[
            pl.BlockSpec((tile_b, IN), lambda i: (i, 0)),   # streamed x tiles (no pad/transpose)
            pl.BlockSpec((H, IN), lambda i: (0, 0)),        # weights stay resident in VMEM
            pl.BlockSpec((H, 1), lambda i: (0, 0)),
            pl.BlockSpec((OUT, H), lambda i: (0, 0)),
            pl.BlockSpec((OUT, 1), lambda i: (0, 0)),
        ],
        out_specs=pl.BlockSpec((OUT, tile_b), lambda i: (0, i)),
        compiler_params=pltpu.CompilerParams(
            dimension_semantics=("parallel",),  # shard batch tiles across TCs (v7x)
        ),
        cost_estimate=cost,
    )(x.astype(jnp.float32), w1.astype(jnp.float32), b1c, w2.astype(jnp.float32), b2c)

    # Back to (B, OUT) to match the nn.Module contract (drop the tiny batch padding).
    # Consumers that accept class-major output can use out_t[:, :B] directly.
    return out_t[:, :B].T


def init_params(key):
    # nn.Linear default init: U(-1/sqrt(fan_in), 1/sqrt(fan_in)); PyTorch (out, in) layout.
    k1, k2, k3, k4 = jax.random.split(key, 4)
    in1, out1 = 18, 8
    in2, out2 = 8, 3
    bnd1 = 1.0 / jnp.sqrt(float(in1))
    bnd2 = 1.0 / jnp.sqrt(float(in2))
    w1 = jax.random.uniform(k1, (out1, in1), jnp.float32, -bnd1, bnd1)
    b1 = jax.random.uniform(k2, (out1,), jnp.float32, -bnd1, bnd1)
    w2 = jax.random.uniform(k3, (out2, in2), jnp.float32, -bnd2, bnd2)
    b2 = jax.random.uniform(k4, (out2,), jnp.float32, -bnd2, bnd2)
    return w1, b1, w2, b2


def _reference(x, w1, b1, w2, b2):
    # PyTorch semantics: sigmoid(x @ W1.T + b1) -> W2 -> softmax over classes.
    h = jax.nn.sigmoid(x @ w1.T + b1)
    logits = h @ w2.T + b2
    return jax.nn.softmax(logits, axis=-1)


if __name__ == "__main__":
    key = jax.random.PRNGKey(0)
    kx, kp, kx2 = jax.random.split(key, 3)
    w1, b1, w2, b2 = init_params(kp)

    # Small-batch case (single partial tile).
    B = 8
    x = jax.random.normal(kx, (B, 18), jnp.float32)
    out = ann_forward(x, w1, b1, w2, b2)
    jax.block_until_ready(out)
    ref = _reference(x, w1, b1, w2, b2)
    assert out.shape == (B, 3)
    assert jnp.allclose(out, ref, atol=1e-5, rtol=1e-5)
    assert jnp.allclose(jnp.sum(out, axis=-1), 1.0, atol=1e-5)

    # Multi-tile case with a ragged last tile (exercises the padded-block path).
    B2 = 300
    x2 = jax.random.normal(kx2, (B2, 18), jnp.float32)
    out2 = ann_forward(x2, w1, b1, w2, b2)
    jax.block_until_ready(out2)
    ref2 = _reference(x2, w1, b1, w2, b2)
    assert out2.shape == (B2, 3)
    assert jnp.allclose(out2, ref2, atol=1e-5, rtol=1e-5)
    assert jnp.allclose(jnp.sum(out2, axis=-1), 1.0, atol=1e-5)

    print("KERNEL_OK")
</pallas_src>

<mosaic_0001>
module attributes {stable_mosaic.version = 11 : i64} {
  func.func @ann_kernel(%arg0: i32, %arg1: memref<128x18xf32, #tpu.memory_space<vmem>>, %arg2: memref<8x18xf32, #tpu.memory_space<vmem>>, %arg3: memref<8x1xf32, #tpu.memory_space<vmem>>, %arg4: memref<3x8xf32, #tpu.memory_space<vmem>>, %arg5: memref<3x1xf32, #tpu.memory_space<vmem>>, %arg6: memref<3x128xf32, #tpu.memory_space<vmem>>) attributes {dimension_semantics = [#tpu.dimension_semantics<parallel>], iteration_bounds = array<i64: 1>, scalar_prefetch = 0 : i64, scratch_operands = 0 : i64, tpu.core_type = #tpu.core_type<tc>, window_params = [{transform_indices = @transform_0, window_bounds = array<i64: 128, 18>}, {pipeline_mode = #tpu.pipeline_mode<synchronous>, transform_indices = @transform_1, window_bounds = array<i64: 8, 18>}, {pipeline_mode = #tpu.pipeline_mode<synchronous>, transform_indices = @transform_2, window_bounds = array<i64: 8, 1>}, {pipeline_mode = #tpu.pipeline_mode<synchronous>, transform_indices = @transform_3, window_bounds = array<i64: 3, 8>}, {pipeline_mode = #tpu.pipeline_mode<synchronous>, transform_indices = @transform_4, window_bounds = array<i64: 3, 1>}, {transform_indices = @transform_5, window_bounds = array<i64: 3, 128>}]} {
    %c0 = arith.constant 0 : index
    %c0_0 = arith.constant 0 : index
    %0 = vector.load %arg1[%c0, %c0_0] : memref<128x18xf32, #tpu.memory_space<vmem>>, vector<128x18xf32>
    %c0_1 = arith.constant 0 : index
    %c0_2 = arith.constant 0 : index
    %1 = vector.load %arg2[%c0_1, %c0_2] : memref<8x18xf32, #tpu.memory_space<vmem>>, vector<8x18xf32>
    %cst = arith.constant dense<0.000000e+00> : vector<8x128xf32>
    %2 = tpu.matmul %1, %0, %cst {dimension_numbers = #tpu.dot_dimension_numbers<[1], [1], [0], [0], [0, 0, 1, 0], [], []>} : vector<8x18xf32>, vector<128x18xf32>, vector<8x128xf32> -> vector<8x128xf32>
    %c0_3 = arith.constant 0 : index
    %c0_4 = arith.constant 0 : index
    %3 = vector.load %arg3[%c0_3, %c0_4] : memref<8x1xf32, #tpu.memory_space<vmem>>, vector<8x1xf32>
    %4 = vector.broadcast %3 : vector<8x1xf32> to vector<8x128xf32>
    %5 = arith.addf %2, %4 : vector<8x128xf32>
    %6 = arith.negf %5 : vector<8x128xf32>
    %7 = math.exp %6 : vector<8x128xf32>
    %cst_5 = arith.constant 1.000000e+00 : f32
    %8 = vector.broadcast %cst_5 : f32 to vector<8x128xf32>
    %9 = arith.addf %8, %7 : vector<8x128xf32>
    %10 = arith.divf %8, %9 : vector<8x128xf32>
    %c0_6 = arith.constant 0 : index
    %c0_7 = arith.constant 0 : index
    %11 = vector.load %arg4[%c0_6, %c0_7] : memref<3x8xf32, #tpu.memory_space<vmem>>, vector<3x8xf32>
    %cst_8 = arith.constant dense<0.000000e+00> : vector<3x128xf32>
    %12 = tpu.matmul %11, %10, %cst_8 {dimension_numbers = #tpu.dot_dimension_numbers<[1], [0], [0], [1], [0, 0, 1, 1], [], []>} : vector<3x8xf32>, vector<8x128xf32>, vector<3x128xf32> -> vector<3x128xf32>
    %c0_9 = arith.constant 0 : index
    %c0_10 = arith.constant 0 : index
    %13 = vector.load %arg5[%c0_9, %c0_10] : memref<3x1xf32, #tpu.memory_space<vmem>>, vector<3x1xf32>
    %14 = vector.broadcast %13 : vector<3x1xf32> to vector<3x128xf32>
    %15 = arith.addf %12, %14 : vector<3x128xf32>
    %cst_11 = arith.constant dense<0xFF800000> : vector<128xf32>
    %16 = vector.multi_reduction <maximumf>, %15, %cst_11 [0] : vector<3x128xf32> to vector<128xf32>
    %17 = vector.shape_cast %16 : vector<128xf32> to vector<1x128xf32>
    %18 = vector.broadcast %17 : vector<1x128xf32> to vector<3x128xf32>
    %19 = arith.subf %15, %18 : vector<3x128xf32>
    %20 = math.exp %19 : vector<3x128xf32>
    %cst_12 = arith.constant dense<0.000000e+00> : vector<128xf32>
    %21 = vector.multi_reduction <add>, %20, %cst_12 [0] : vector<3x128xf32> to vector<128xf32>
    %22 = vector.shape_cast %21 : vector<128xf32> to vector<1x128xf32>
    %23 = tpu.reciprocal %22 : vector<1x128xf32> -> vector<1x128xf32>
    %24 = vector.broadcast %23 : vector<1x128xf32> to vector<3x128xf32>
    %25 = arith.mulf %20, %24 : vector<3x128xf32>
    %c0_13 = arith.constant 0 : index
    %c0_14 = arith.constant 0 : index
    %26 = vector.load %arg6[%c0_13, %c0_14] : memref<3x128xf32, #tpu.memory_space<vmem>>, vector<3x128xf32>
    tpu.vector_store %arg6[%c0_13, %c0_14], %25 {strides = array<i32>} : memref<3x128xf32, #tpu.memory_space<vmem>>, vector<3x128xf32>,
    return
  }
  func.func @transform_0(%arg0: i32) -> (i32, i32) {
    %c0_i32 = arith.constant 0 : i32
    %c0_i32_0 = arith.constant 0 : i32
    return %arg0, %c0_i32 : i32, i32
  }
  func.func @transform_1(%arg0: i32) -> (i32, i32) {
    %c0_i32 = arith.constant 0 : i32
    %c0_i32_0 = arith.constant 0 : i32
    %c0_i32_1 = arith.constant 0 : i32
    return %c0_i32, %c0_i32_0 : i32, i32
  }
  func.func @transform_2(%arg0: i32) -> (i32, i32) {
    %c0_i32 = arith.constant 0 : i32
    %c0_i32_0 = arith.constant 0 : i32
    %c0_i32_1 = arith.constant 0 : i32
    return %c0_i32, %c0_i32_0 : i32, i32
  }
  func.func @transform_3(%arg0: i32) -> (i32, i32) {
    %c0_i32 = arith.constant 0 : i32
    %c0_i32_0 = arith.constant 0 : i32
    %c0_i32_1 = arith.constant 0 : i32
    return %c0_i32, %c0_i32_0 : i32, i32
  }
  func.func @transform_4(%arg0: i32) -> (i32, i32) {
    %c0_i32 = arith.constant 0 : i32
    %c0_i32_0 = arith.constant 0 : i32
    %c0_i32_1 = arith.constant 0 : i32
    return %c0_i32, %c0_i32_0 : i32, i32
  }
  func.func @transform_5(%arg0: i32) -> (i32, i32) {
    %c0_i32 = arith.constant 0 : i32
    %c0_i32_0 = arith.constant 0 : i32
    return %c0_i32, %arg0 : i32, i32
  }
}

</mosaic_0001>

<bundles_post_ra>
// kernel: ann_forward.1
= control target key start
LH: loop header
LB: loop body
LE: loop exit
PB: predicated region body
PF: predicated region fallthrough
CT: control target
= control target key end

     0   :  { %10 = vsyncpa [#allocation3], 0  ;;  %s274_s21 = smov [#allocation2]   ;;  %s386_s0 = inlined_call_operand.vmem [shape: f32[8,18], index: 0, kind: input, shape index: {}]   ;;  %s387_s1 = inlined_call_operand.vmem [shape: f32[8,18], index: 1, kind: input, shape index: {}]   ;;  %s388_s2 = inlined_call_operand.vmem [shape: f32[8,1], index: 2, kind: input, shape index: {}]   ;;  %s389_s3 = inlined_call_operand.hbm [shape: f32[3,8], index: 3, kind: input, shape index: {}]   ;;  %s390_s4 = inlined_call_operand.vmem [shape: f32[3,1], index: 4, kind: input, shape index: {}]   ;;  %s391_s5 = inlined_call_operand.vmem [shape: f32[3,128], index: 5, kind: output, shape index: {}]  }
   0x1   :  { %s22_s20 = sshll.u32 %s389_s3, 4  ;;  %s24_s22 = sshll.u32 %s274_s21, 4  ;;  %s23_s20 = int_to_ptr.hbm [resolvable:$true] %s22_s20  ;;  %s25_s22 = int_to_ptr.vmem [resolvable:$true] %s24_s22 }
   0x2   :  { %27 = dma.hbm_to_vmem [thread:$0]  %s23_s20, 64, %s25_s22, [#allocation3]  }
   0x3   :  { %272 = dma.done.wait [#allocation3], 64  }
   0x4   :  { %273 = vsyncadd [#allocation3], 4294967232  ;;  %vm57_vm0 = vcmask 146432   ;;  %v49_v0 = vld [vmem:[%s386_s0 + $0x78] sm:$0xff]  ;;  %v48_v1 = vld [vmem:[%s386_s0 + $0x70] sm:$0xff]  ;;  %v275_v10 = vmov 0  }
   0x5   :  { %218 = vmatpush.xpose.msk.msra.mxu0 %vm57_vm0, %v49_v0  ;;  %v47_v2 = vld [vmem:[%s386_s0 + $0x68] sm:$0xff]  ;;  %v46_v3 = vld [vmem:[%s386_s0 + $0x60] sm:$0xff]  ;;  %v45_v4 = vld [vmem:[%s386_s0 + $0x58] sm:$0xff]  ;;  %239 = vset.pattern.permute.xlu0 %v275_v10  ;;  %vm155_vm5 = vcmask 64512   ;;  %vm179_vm6 = vcmask 1042432  }
   0x6   :  { %v44_v5 = vld [vmem:[%s386_s0 + $0x50] sm:$0xff]  ;;  %v43_v6 = vld [vmem:[%s386_s0 + $0x48] sm:$0xff]  ;;  %v42_v7 = vld [vmem:[%s386_s0 + $0x40] sm:$0xff] }
   0x7   :  { %v41_v8 = vld [vmem:[%s386_s0 + $0x38] sm:$0xff]  ;;  %v51_v9 = vld [vmem:[%s388_s2] sm:$0xff]  ;;  %v40_v11 = vld [vmem:[%s386_s0 + $0x30] sm:$0xff] }
   0x8   :  { %54 = vperm.xlu0 %239, %v51_v9   ;;  %v39_v12 = vld [vmem:[%s386_s0 + $0x28] sm:$0xff]  ;;  %v149_v13 = vld [vmem:[%s390_s4] sm:$0x7]  ;;  %v37_v15 = vld [vmem:[%s386_s0 + $0x18] sm:$0xff] }
   0x9   :  { %219 = vmatpush.xpose.msk.msra.mxu0 %vm57_vm0, %v48_v1  ;;  %v38_v14 = vld [vmem:[%s386_s0 + $0x20] sm:$0xff]  ;;  %v36_v16 = vld [vmem:[%s386_s0 + $0x10] sm:$0xff]  ;;  %v35_v17 = vld [vmem:[%s386_s0 + $0x8] sm:$0xff] }
   0xa   :  { %v34_v18 = vld [vmem:[%s386_s0] sm:$0xff] }
   0xb   :  { %v50_v19 = vld [vmem:[%s387_s1] sm:$0xff] }
   0xc   :  { %v148_v35 = vld [vmem:[#allocation2] sm:$0x7] }
   0xd   :  { %220 = vmatpush.xpose.msk.msra.mxu0 %vm57_vm0, %v47_v2 }
  0x10   :  { %152 = vperm.xlu0 %239, %v149_v13  }
  0x11   :  { %221 = vmatpush.xpose.msk.msra.mxu0 %vm57_vm0, %v46_v3 }
  0x15   :  { %222 = vmatpush.xpose.msk.msra.mxu0 %vm57_vm0, %v45_v4 }
  0x19   :  { %223 = vmatpush.xpose.msk.msra.mxu0 %vm57_vm0, %v44_v5 }
  0x1d   :  { %224 = vmatpush.xpose.msk.msra.mxu0 %vm57_vm0, %v43_v6 }
  0x21   :  { %225 = vmatpush.xpose.msk.msra.mxu0 %vm57_vm0, %v42_v7 }
  0x25   :  { %226 = vmatpush.xpose.msk.msra.mxu0 %vm57_vm0, %v41_v8 }
  0x29   :  { %227 = vmatpush.xpose.msk.msra.mxu0 %vm57_vm0, %v40_v11 }
  0x2d   :  { %228 = vmatpush.xpose.msk.msra.mxu0 %vm57_vm0, %v39_v12 }
  0x31   :  { %229 = vmatpush.xpose.msk.msra.mxu0 %vm57_vm0, %v38_v14 }
  0x35   :  { %230 = vmatpush.xpose.msk.msra.mxu0 %vm57_vm0, %v37_v15 }
  0x39   :  { %231 = vmatpush.xpose.msk.msra.mxu0 %vm57_vm0, %v36_v16 }
  0x3d   :  { %232 = vmatpush.xpose.msk.msra.mxu0 %vm57_vm0, %v35_v17 }
  0x41   :  { %233 = vmatpush.xpose.msk.msra.mxu0 %vm57_vm0, %v34_v18 }
  0x44   :  { %234 = vmatmul.msk.f32.vlgmr.msra.gmra.mxu0 %vm57_vm0, %v50_v19 }
  0x7a   :  { %v55_v20 = vpop.permute.xlu0 %54 }
  0x82   :  { %v153_v37 = vpop.permute.xlu0 %152 }
  0xc1   :  { %v126_v21 = vpop.f32.mrf.mxu0 }
  0xc2   :  { %v127_v22 = vadd.f32 %v126_v21, %v55_v20 }
  0xc4   :  { %v235_v23 = vmul.f32 -1.442695, %v127_v22 }
  0xc6   :  { %240 = vpow2.f32 %v235_v23 }
  0xcc   :  { %v241_v24 = vpop.eup %240 }
  0xcd   :  { %v132_v25 = vadd.f32 1.0, %v241_v24 }
  0xcf   :  { %242 = vrcp.f32 %v132_v25  ;;  %v144_v29 = vand.u32 2147483648, %v132_v25  ;;  %v142_v31 = vand.u32 2147483647, %v132_v25  ;;  %vm138_vm2 = vweird.f32 %v132_v25 }
  0xd1   :  { %v145_v33 = vor.u32 1.1754944e-38, %v144_v29  ;;  %vm143_vm4 = vcmp.eq.f32.partialorder %v142_v31, 8.507059e+37 }
  0xd5   :  { %v243_v26 = vpop.eup %242 }
  0xd6   :  { %v134_v27 = vmul.f32 %v243_v26, %v132_v25  ;;  %vm139_vm1 = vweird.f32 %v243_v26 }
  0xd7   :  { %vm140_vm3 = vmor %vm138_vm2, %vm139_vm1 }
  0xd8   :  { %v135_v28 = vsub.f32 1.0, %v134_v27 }
  0xda   :  { %v136_v30 = vmul.f32 %v243_v26, %v135_v28 }
  0xdc   :  { %v137_v32 = vadd.f32 %v243_v26, %v136_v30 }
  0xde   :  { %v141_v34 = vsel %vm140_vm3, %v243_v26, %v137_v32 }
  0xdf   :  { %v146_v36 = vsel %vm143_vm4, %v145_v33, %v141_v34 }
  0xe0   :  { %174 = vmatpush.msra.mxu1 %v146_v36 }
  0xe1   :  { %236 = vmatmul.msk.f32.vlgmr.msra.gmra.mxu1 %vm155_vm5, %v148_v35 }
 0x15e   :  { %v176_v38 = vpop.f32.mrf.mxu1 }
 0x15f   :  { %v177_v39 = vadd.f32 %v176_v38, %v153_v37 }
 0x161   :  { %v180_v40 = vsel %vm179_vm6, %v177_v39, -inf }
 0x162   :  { %v181_v41 = vrot.slane %v180_v40, 4 }
 0x164   :  { %v182_v42 = vmax.f32 %v180_v40, %v181_v41 }
 0x166   :  { %v183_v43 = vrot.slane %v182_v42, 2 }
 0x168   :  { %v184_v44 = vmax.f32 %v182_v42, %v183_v43 }
 0x16a   :  { %v185_v45 = vrot.slane %v184_v44, 1 }
 0x16c   :  { %v186_v46 = vmax.f32 %v184_v44, %v185_v45 }
 0x16e   :  { %v187_v47 = vsub.f32 %v177_v39, %v186_v46 }
 0x170   :  { %v188_v48 = vmul.f32 1.442695, %v187_v47 }
 0x172   :  { %244 = vpow2.f32 %v188_v48 }
 0x178   :  { %v245_v49 = vpop.eup %244 }
 0x179   :  { %v190_v50 = vsel %vm179_vm6, %v245_v49, 0.0 }
 0x17a   :  { %v191_v51 = vrot.slane %v190_v50, 4 }
 0x17c   :  { %v192_v52 = vadd.f32 %v191_v51, %v190_v50 }
 0x17e   :  { %v193_v53 = vrot.slane %v192_v52, 2 }
 0x180   :  { %v194_v54 = vadd.f32 %v193_v53, %v192_v52 }
 0x182   :  { %v195_v55 = vrot.slane %v194_v54, 1 }
 0x184   :  { %v196_v56 = vadd.f32 %v195_v55, %v194_v54 }
 0x186   :  { %246 = vrcp.f32 %v196_v56  ;;  %v208_v60 = vand.u32 2147483648, %v196_v56  ;;  %v206_v62 = vand.u32 2147483647, %v196_v56  ;;  %vm202_vm8 = vweird.f32 %v196_v56 }
 0x188   :  { %v209_v0 = vor.u32 1.1754944e-38, %v208_v60  ;;  %vm207_vm10 = vcmp.eq.f32.partialorder %v206_v62, 8.507059e+37 }
 0x18c   :  { %v247_v57 = vpop.eup %246 }
 0x18d   :  { %v198_v58 = vmul.f32 %v247_v57, %v196_v56  ;;  %vm203_vm7 = vweird.f32 %v247_v57 }
 0x18e   :  { %vm204_vm9 = vmor %vm202_vm8, %vm203_vm7 }
 0x18f   :  { %v199_v59 = vsub.f32 1.0, %v198_v58 }
 0x191   :  { %v200_v61 = vmul.f32 %v247_v57, %v199_v59 }
 0x193   :  { %v201_v63 = vadd.f32 %v247_v57, %v200_v61 }
 0x195   :  { %v205_v1 = vsel %vm204_vm9, %v247_v57, %v201_v63 }
 0x196   :  { %v210_v2 = vsel %vm207_vm10, %v209_v0, %v205_v1 }
 0x197   :  { %v211_v3 = vmul.f32 %v245_v49, %v210_v2 }
 0x199   :  { %212 = vst [vmem:[%s391_s5] sm:$0x7] %v211_v3 }
 0x19a   :  { %217 = vsyncpa [#allocation3], 1 }

</bundles_post_ra>
